<compile_context>
chip_gen: v7x
topology: tpu7x:2x2x1
jax: 0.10.0
libtpu: 0.0.40
codegen_flags: <defaults>
</compile_context>

<pallas_src>
import jax
import jax.numpy as jnp
from jax.experimental import pallas as pl
from jax.experimental.pallas import tpu as pltpu


def dqn_kernel(x_ref, w1_ref, b1_ref, w2_ref, b2_ref, w3_ref, b3_ref, o_ref):
    # fc1 + relu (MXU accumulates in f32 regardless of the input/storage dtype)
    h1 = jnp.dot(x_ref[...], w1_ref[...], preferred_element_type=jnp.float32)
    h1 = jnp.maximum(h1 + b1_ref[...], 0.0)
    # fc2 + relu
    h2 = jnp.dot(h1.astype(w2_ref.dtype), w2_ref[...],
                 preferred_element_type=jnp.float32)
    h2 = jnp.maximum(h2 + b2_ref[...], 0.0)
    # fc3 (no activation)
    out = jnp.dot(h2.astype(w3_ref.dtype), w3_ref[...],
                  preferred_element_type=jnp.float32) + b3_ref[...]
    o_ref[...] = out.astype(o_ref.dtype)


def _round_up(x, m):
    return ((x + m - 1) // m) * m


def dqn_forward(x, params, *, tile_batch=512, compute_dtype=jnp.float32):
    """Equivalent of DQN.forward: x.view(-1, 20) -> fc1/relu -> fc2/relu -> fc3."""
    w1, b1, w2, b2, w3, b3 = params
    x2d = x.reshape(-1, 20)
    B = x2d.shape[0]

    # Batch tile: multiple of 8 (f32 sublane), never bigger than the (padded) batch.
    TB = min(int(tile_batch), _round_up(B, 8))
    TB = _round_up(TB, 8)
    Bp = _round_up(B, TB)           # pad the ragged last tile in the wrapper
    num_tiles = Bp // TB

    x2d = x2d.astype(compute_dtype)
    if Bp != B:
        x2d = jnp.pad(x2d, ((0, Bp - B), (0, 0)))

    # Weights in the compute dtype (bf16 halves the streaming HBM read at large B);
    # biases stay f32 and are added to the f32 accumulator.
    w1c, w2c, w3c = (w.astype(compute_dtype) for w in (w1, w2, w3))
    b1c, b2c, b3c = (b.astype(jnp.float32) for b in (b1, b2, b3))

    # Constant block index across all grid steps -> Pallas skips re-fetch: the ~43 KB of
    # weights/biases are DMA'd once and stay VMEM-resident while x streams per tile.
    const2d = lambda arr: pl.BlockSpec(arr.shape, lambda i: (0, 0))

    out = pl.pallas_call(
        dqn_kernel,
        out_shape=jax.ShapeDtypeStruct((Bp, 2), jnp.float32),
        grid=(num_tiles,),
        in_specs=[
            pl.BlockSpec((TB, 20), lambda i: (i, 0)),   # x: streamed per batch tile
            const2d(w1c), const2d(b1c),
            const2d(w2c), const2d(b2c),
            const2d(w3c), const2d(b3c),
        ],
        out_specs=pl.BlockSpec((TB, 2), lambda i: (i, 0)),
        compiler_params=pltpu.CompilerParams(
            # Batch tiles are independent -> shard across v7x's 2 TensorCores.
            dimension_semantics=("parallel",),
        ),
    )(x2d, w1c, b1c, w2c, b2c, w3c, b3c)

    return out[:B]


def init_params(key):
    """Deterministic init matching PyTorch Linear shapes (stored transposed as (in, out))."""
    ks = jax.random.split(key, 6)

    def linear(kw, kb, fan_in, fan_out):
        bound = 1.0 / jnp.sqrt(fan_in)
        w = jax.random.uniform(kw, (fan_in, fan_out), jnp.float32, -bound, bound)
        b = jax.random.uniform(kb, (1, fan_out), jnp.float32, -bound, bound)
        return w, b

    w1, b1 = linear(ks[0], ks[1], 20, 128)
    w2, b2 = linear(ks[2], ks[3], 128, 64)
    w3, b3 = linear(ks[4], ks[5], 64, 2)
    return (w1, b1, w2, b2, w3, b3)


if __name__ == "__main__":
    key = jax.random.PRNGKey(0)
    pkey, xkey = jax.random.split(key)
    params = init_params(pkey)

    def ref_fwd(xin):
        w1, b1, w2, b2, w3, b3 = params
        h = jnp.maximum(xin.reshape(-1, 20) @ w1 + b1, 0.0)
        h = jnp.maximum(h @ w2 + b2, 0.0)
        return h @ w3 + b3

    # Small example input; forward does x.view(-1, 20), so feed (B, 20).
    x = jax.random.normal(xkey, (8, 20), jnp.float32)
    out = jax.block_until_ready(dqn_forward(x, params))
    assert out.shape == (8, 2)
    assert jnp.allclose(out, ref_fwd(x), atol=1e-5, rtol=1e-5)

    # Exercise the batch-tiled path: multiple grid steps + padded ragged last tile.
    xb = jax.random.normal(jax.random.PRNGKey(1), (600, 20), jnp.float32)
    out_b = jax.block_until_ready(dqn_forward(xb, params, tile_batch=256))
    assert out_b.shape == (600, 2)
    assert jnp.allclose(out_b, ref_fwd(xb), atol=1e-5, rtol=1e-5)

    # bf16 storage/streaming path (f32 accumulation) -- looser tolerance vs f32 reference.
    out_bf16 = jax.block_until_ready(
        dqn_forward(xb, params, tile_batch=256, compute_dtype=jnp.bfloat16))
    assert out_bf16.shape == (600, 2)
    assert jnp.allclose(out_bf16, ref_fwd(xb), atol=1e-1, rtol=1e-1)

    print("KERNEL_OK")
</pallas_src>

<mosaic_0001>
module attributes {stable_mosaic.version = 11 : i64} {
  func.func @dqn_kernel(%arg0: i32, %arg1: memref<8x20xf32, #tpu.memory_space<vmem>>, %arg2: memref<20x128xf32, #tpu.memory_space<vmem>>, %arg3: memref<1x128xf32, #tpu.memory_space<vmem>>, %arg4: memref<128x64xf32, #tpu.memory_space<vmem>>, %arg5: memref<1x64xf32, #tpu.memory_space<vmem>>, %arg6: memref<64x2xf32, #tpu.memory_space<vmem>>, %arg7: memref<1x2xf32, #tpu.memory_space<vmem>>, %arg8: memref<8x2xf32, #tpu.memory_space<vmem>>) attributes {dimension_semantics = [#tpu.dimension_semantics<parallel>], iteration_bounds = array<i64: 1>, scalar_prefetch = 0 : i64, scratch_operands = 0 : i64, tpu.core_type = #tpu.core_type<tc>, window_params = [{transform_indices = @transform_0, window_bounds = array<i64: 8, 20>}, {pipeline_mode = #tpu.pipeline_mode<synchronous>, transform_indices = @transform_1, window_bounds = array<i64: 20, 128>}, {pipeline_mode = #tpu.pipeline_mode<synchronous>, transform_indices = @transform_2, window_bounds = array<i64: 1, 128>}, {pipeline_mode = #tpu.pipeline_mode<synchronous>, transform_indices = @transform_3, window_bounds = array<i64: 128, 64>}, {pipeline_mode = #tpu.pipeline_mode<synchronous>, transform_indices = @transform_4, window_bounds = array<i64: 1, 64>}, {pipeline_mode = #tpu.pipeline_mode<synchronous>, transform_indices = @transform_5, window_bounds = array<i64: 64, 2>}, {pipeline_mode = #tpu.pipeline_mode<synchronous>, transform_indices = @transform_6, window_bounds = array<i64: 1, 2>}, {transform_indices = @transform_7, window_bounds = array<i64: 8, 2>}]} {
    %c0 = arith.constant 0 : index
    %c0_0 = arith.constant 0 : index
    %0 = vector.load %arg1[%c0, %c0_0] : memref<8x20xf32, #tpu.memory_space<vmem>>, vector<8x20xf32>
    %c0_1 = arith.constant 0 : index
    %c0_2 = arith.constant 0 : index
    %1 = vector.load %arg2[%c0_1, %c0_2] : memref<20x128xf32, #tpu.memory_space<vmem>>, vector<20x128xf32>
    %cst = arith.constant dense<0.000000e+00> : vector<8x128xf32>
    %2 = tpu.matmul %0, %1, %cst {dimension_numbers = #tpu.dot_dimension_numbers<[1], [0], [0], [1], [0, 0, 1, 1], [], []>} : vector<8x20xf32>, vector<20x128xf32>, vector<8x128xf32> -> vector<8x128xf32>
    %c0_3 = arith.constant 0 : index
    %c0_4 = arith.constant 0 : index
    %3 = vector.load %arg3[%c0_3, %c0_4] : memref<1x128xf32, #tpu.memory_space<vmem>>, vector<1x128xf32>
    %4 = vector.broadcast %3 : vector<1x128xf32> to vector<8x128xf32>
    %5 = arith.addf %2, %4 : vector<8x128xf32>
    %cst_5 = arith.constant 0.000000e+00 : f32
    %6 = vector.broadcast %cst_5 : f32 to vector<8x128xf32>
    %7 = arith.maximumf %5, %6 : vector<8x128xf32>
    %c0_6 = arith.constant 0 : index
    %c0_7 = arith.constant 0 : index
    %8 = vector.load %arg4[%c0_6, %c0_7] : memref<128x64xf32, #tpu.memory_space<vmem>>, vector<128x64xf32>
    %cst_8 = arith.constant dense<0.000000e+00> : vector<8x64xf32>
    %9 = tpu.matmul %7, %8, %cst_8 {dimension_numbers = #tpu.dot_dimension_numbers<[1], [0], [0], [1], [0, 0, 1, 1], [], []>} : vector<8x128xf32>, vector<128x64xf32>, vector<8x64xf32> -> vector<8x64xf32>
    %c0_9 = arith.constant 0 : index
    %c0_10 = arith.constant 0 : index
    %10 = vector.load %arg5[%c0_9, %c0_10] : memref<1x64xf32, #tpu.memory_space<vmem>>, vector<1x64xf32>
    %11 = vector.broadcast %10 : vector<1x64xf32> to vector<8x64xf32>
    %12 = arith.addf %9, %11 : vector<8x64xf32>
    %cst_11 = arith.constant 0.000000e+00 : f32
    %13 = vector.broadcast %cst_11 : f32 to vector<8x64xf32>
    %14 = arith.maximumf %12, %13 : vector<8x64xf32>
    %c0_12 = arith.constant 0 : index
    %c0_13 = arith.constant 0 : index
    %15 = vector.load %arg6[%c0_12, %c0_13] : memref<64x2xf32, #tpu.memory_space<vmem>>, vector<64x2xf32>
    %cst_14 = arith.constant dense<0.000000e+00> : vector<8x2xf32>
    %16 = tpu.matmul %14, %15, %cst_14 {dimension_numbers = #tpu.dot_dimension_numbers<[1], [0], [0], [1], [0, 0, 1, 1], [], []>} : vector<8x64xf32>, vector<64x2xf32>, vector<8x2xf32> -> vector<8x2xf32>
    %c0_15 = arith.constant 0 : index
    %c0_16 = arith.constant 0 : index
    %17 = vector.load %arg7[%c0_15, %c0_16] : memref<1x2xf32, #tpu.memory_space<vmem>>, vector<1x2xf32>
    %18 = vector.broadcast %17 : vector<1x2xf32> to vector<8x2xf32>
    %19 = arith.addf %16, %18 : vector<8x2xf32>
    %c0_17 = arith.constant 0 : index
    %c0_18 = arith.constant 0 : index
    %20 = vector.load %arg8[%c0_17, %c0_18] : memref<8x2xf32, #tpu.memory_space<vmem>>, vector<8x2xf32>
    tpu.vector_store %arg8[%c0_17, %c0_18], %19 {strides = array<i32>} : memref<8x2xf32, #tpu.memory_space<vmem>>, vector<8x2xf32>,
    return
  }
  func.func @transform_0(%arg0: i32) -> (i32, i32) {
    %c0_i32 = arith.constant 0 : i32
    %c0_i32_0 = arith.constant 0 : i32
    return %arg0, %c0_i32 : i32, i32
  }
  func.func @transform_1(%arg0: i32) -> (i32, i32) {
    %c0_i32 = arith.constant 0 : i32
    %c0_i32_0 = arith.constant 0 : i32
    %c0_i32_1 = arith.constant 0 : i32
    return %c0_i32, %c0_i32_0 : i32, i32
  }
  func.func @transform_2(%arg0: i32) -> (i32, i32) {
    %c0_i32 = arith.constant 0 : i32
    %c0_i32_0 = arith.constant 0 : i32
    %c0_i32_1 = arith.constant 0 : i32
    return %c0_i32, %c0_i32_0 : i32, i32
  }
  func.func @transform_3(%arg0: i32) -> (i32, i32) {
    %c0_i32 = arith.constant 0 : i32
    %c0_i32_0 = arith.constant 0 : i32
    %c0_i32_1 = arith.constant 0 : i32
    return %c0_i32, %c0_i32_0 : i32, i32
  }
  func.func @transform_4(%arg0: i32) -> (i32, i32) {
    %c0_i32 = arith.constant 0 : i32
    %c0_i32_0 = arith.constant 0 : i32
    %c0_i32_1 = arith.constant 0 : i32
    return %c0_i32, %c0_i32_0 : i32, i32
  }
  func.func @transform_5(%arg0: i32) -> (i32, i32) {
    %c0_i32 = arith.constant 0 : i32
    %c0_i32_0 = arith.constant 0 : i32
    %c0_i32_1 = arith.constant 0 : i32
    return %c0_i32, %c0_i32_0 : i32, i32
  }
  func.func @transform_6(%arg0: i32) -> (i32, i32) {
    %c0_i32 = arith.constant 0 : i32
    %c0_i32_0 = arith.constant 0 : i32
    %c0_i32_1 = arith.constant 0 : i32
    return %c0_i32, %c0_i32_0 : i32, i32
  }
  func.func @transform_7(%arg0: i32) -> (i32, i32) {
    %c0_i32 = arith.constant 0 : i32
    %c0_i32_0 = arith.constant 0 : i32
    return %arg0, %c0_i32 : i32, i32
  }
}

</mosaic_0001>

<bundles_post_ra>
// kernel: tpu_custom_call.1
= control target key start
LH: loop header
LB: loop body
LE: loop exit
PB: predicated region body
PF: predicated region fallthrough
CT: control target
= control target key end

     0   :  { %v446_v0 = vmov 0.0|0.0   ;;  %vm447_vm0 = vmmov 0   ;;  %v448_v3 = vmov 0.0   ;;  %vm41_vm1 = vcmask 1043456   ;;  %s601_s1 = inlined_call_operand.vmem [shape: f32[20,128], index: 1, kind: input, shape index: {}]   ;;  %s602_s3 = inlined_call_operand.vmem [shape: f32[128,64], index: 3, kind: input, shape index: {}]   ;;  %s603_s0 = inlined_call_operand.vmem [shape: f32[8,20], index: 0, kind: input, shape index: {}]   ;;  %s604_s5 = inlined_call_operand.vmem [shape: f32[64,2], index: 5, kind: input, shape index: {}]   ;;  %s605_s2 = inlined_call_operand.vmem [shape: f32[1,128], index: 2, kind: input, shape index: {}]   ;;  %s606_s4 = inlined_call_operand.vmem [shape: f32[1,64], index: 4, kind: input, shape index: {}]   ;;  %s607_s6 = inlined_call_operand.vmem [shape: f32[1,2], index: 6, kind: input, shape index: {}]   ;;  %s608_s7 = inlined_call_operand.vmem [shape: f32[8,2], index: 7, kind: output, shape index: {}]  }
   0x1   :  { %404 = vmatprep.subr.bf16.mxu0 %v446_v0  ;;  %v27_v1 = vld [vmem:[%s601_s1] sm:$0xff]  ;;  %v28_v2 = vld [vmem:[%s601_s1 + $0x8] sm:$0xff]  ;;  %347 = vmatprep.mubr.msk.f32.mxu0 %vm447_vm0, %v448_v3  ;;  %v118_v8 = vld [vmem:[%s602_s3 + $0x10] sm:$0xff]  ;;  %vm37_vm2 = vcmask 162816   ;;  %vm225_vm3 = vcmask 523264   ;;  %vm299_vm4 = vcmask 15360  }
   0x2   :  { %v405_v4 = vpack.c.bf16 %v28_v2, %v27_v1  ;;  %407 = vmatprep.subr.bf16.mxu1 %v446_v0  ;;  %v116_v5 = vld [vmem:[%s602_s3] sm:$0xff]  ;;  %v117_v6 = vld [vmem:[%s602_s3 + $0x8] sm:$0xff]  ;;  %382 = vmatprep.mubr.msk.f32.mxu1 %vm447_vm0, %v448_v3  ;;  %v119_v9 = vld [vmem:[%s602_s3 + $0x18] sm:$0xff] }
   0x3   :  { %v408_v7 = vpack.c.bf16 %v117_v6, %v116_v5  ;;  %v29_v10 = vld [vmem:[%s601_s1 + $0x10] sm:$0xf]  ;;  %v411_v11 = vpack.c.bf16 %v119_v9, %v118_v8  ;;  %v26_v12 = vld [vmem:[%s603_s0] sm:$0xff]  ;;  %v121_v14 = vld [vmem:[%s602_s3 + $0x28] sm:$0xff] }
   0x4   :  { %406 = vmatpush3.bf16.msra.mxu0 %v405_v4  ;;  %v120_v13 = vld [vmem:[%s602_s3 + $0x20] sm:$0xff]  ;;  %v122_v16 = vld [vmem:[%s602_s3 + $0x30] sm:$0xff]  ;;  %v123_v17 = vld [vmem:[%s602_s3 + $0x38] sm:$0xff] }
   0x5   :  { %345 = vmatprep.subr.mxu0 %v448_v3  ;;  %409 = vmatpush3.bf16.msra.mxu1 %v408_v7  ;;  %v414_v15 = vpack.c.bf16 %v121_v14, %v120_v13  ;;  %v417_v18 = vpack.c.bf16 %v123_v17, %v122_v16  ;;  %v124_v19 = vld [vmem:[%s602_s3 + $0x40] sm:$0xff]  ;;  %v125_v20 = vld [vmem:[%s602_s3 + $0x48] sm:$0xff]  ;;  %v126_v22 = vld [vmem:[%s602_s3 + $0x50] sm:$0xff] }
   0x6   :  { %410 = vmatprep.subr.bf16.mxu1 %v446_v0  ;;  %v420_v21 = vpack.c.bf16 %v125_v20, %v124_v19  ;;  %v127_v23 = vld [vmem:[%s602_s3 + $0x58] sm:$0xff]  ;;  %v128_v25 = vld [vmem:[%s602_s3 + $0x60] sm:$0xff]  ;;  %v129_v26 = vld [vmem:[%s602_s3 + $0x68] sm:$0xff] }
   0x7   :  { %v423_v24 = vpack.c.bf16 %v127_v23, %v126_v22  ;;  %v426_v27 = vpack.c.bf16 %v129_v26, %v128_v25  ;;  %v130_v28 = vld [vmem:[%s602_s3 + $0x70] sm:$0xff]  ;;  %v131_v29 = vld [vmem:[%s602_s3 + $0x78] sm:$0xff]  ;;  %v210_v31 = vld [vmem:[%s604_s5] sm:$0xff] }
   0x8   :  { %346 = vmatpush3.msk.msra.mxu0 %vm41_vm1, %v29_v10  ;;  %v429_v30 = vpack.c.bf16 %v131_v29, %v130_v28  ;;  %v211_v32 = vld [vmem:[%s604_s5 + $0x8] sm:$0xff]  ;;  %v212_v33 = vld [vmem:[%s604_s5 + $0x10] sm:$0xff]  ;;  %v213_v35 = vld [vmem:[%s604_s5 + $0x18] sm:$0xff] }
   0x9   :  { %348 = vmatmul.mubr.msk.f32.vlgmr.msra.gmra.mrb[0].mxu0 %vm37_vm2, %v26_v12  ;;  %412 = vmatpush3.bf16.msra.mxu1 %v411_v11  ;;  %v432_v34 = vpack.c.bf16 %v211_v32, %v210_v31  ;;  %v435_v36 = vpack.c.bf16 %v213_v35, %v212_v33  ;;  %v214_v37 = vld [vmem:[%s604_s5 + $0x20] sm:$0xff]  ;;  %v215_v38 = vld [vmem:[%s604_s5 + $0x28] sm:$0xff]  ;;  %v216_v45 = vld [vmem:[%s604_s5 + $0x30] sm:$0xff] }
   0xa   :  { %413 = vmatprep.subr.bf16.mxu1 %v446_v0  ;;  %431 = vmatprep.subr.bf16.mxu0 %v446_v0  ;;  %v438_v39 = vpack.c.bf16 %v215_v38, %v214_v37  ;;  %v305_v40 = vld [vmem:[%s605_s2] ss:$0 sm:$0xff]  ;;  %v217_v46 = vld [vmem:[%s604_s5 + $0x38] sm:$0xff] }
   0xb   :  { %401 = vmatprep.mubr.msk.f32.mxu0 %vm447_vm0, %v448_v3  ;;  %433 = vmatpush3.bf16.msra.mxu0 %v432_v34  ;;  %v441_v47 = vpack.c.bf16 %v217_v46, %v216_v45  ;;  %v308_v48 = vld [vmem:[%s606_s4] ss:$0 sm:$0xff] }
   0xc   :  { %434 = vmatprep.subr.bf16.mxu0 %v446_v0  ;;  %v309_v53 = vld [vmem:[%s607_s6] ss:$0 sm:$0xff] }
   0xd   :  { %415 = vmatpush3.bf16.msra.mxu1 %v414_v15 }
   0xe   :  { %416 = vmatprep.subr.bf16.mxu1 %v446_v0 }
   0xf   :  { %436 = vmatpush3.bf16.msra.mxu0 %v435_v36 }
  0x10   :  { %437 = vmatprep.subr.bf16.mxu0 %v446_v0 }
  0x11   :  { %418 = vmatpush3.bf16.msra.mxu1 %v417_v18 }
  0x12   :  { %419 = vmatprep.subr.bf16.mxu1 %v446_v0 }
  0x13   :  { %439 = vmatpush3.bf16.msra.mxu0 %v438_v39 }
  0x14   :  { %440 = vmatprep.subr.bf16.mxu0 %v446_v0 }
  0x15   :  { %421 = vmatpush3.bf16.msra.mxu1 %v420_v21 }
  0x16   :  { %422 = vmatprep.subr.bf16.mxu1 %v446_v0 }
  0x17   :  { %442 = vmatpush3.bf16.msra.mxu0 %v441_v47 }
  0x19   :  { %424 = vmatpush3.bf16.msra.mxu1 %v423_v24 }
  0x1a   :  { %425 = vmatprep.subr.bf16.mxu1 %v446_v0 }
  0x1d   :  { %427 = vmatpush3.bf16.msra.mxu1 %v426_v27 }
  0x1e   :  { %428 = vmatprep.subr.bf16.mxu1 %v446_v0 }
  0x21   :  { %430 = vmatpush3.bf16.msra.mxu1 %v429_v30 }
  0xdc   :  { %v111_v41 = vpop.f32.mrb[0].mxu0 }
  0xdd   :  { %v112_v42 = vadd.f32 %v305_v40, %v111_v41  ;;  %v349_v43 = vpop.f32.mrb[1].mxu0 }
  0xdf   :  { %v115_v44 = vmax.f32 %v112_v42, 0.0 }
  0xe1   :  { %383 = vmatmul.mubr.f32.vlgmr.msra.gmra.mrb[0].mxu1 %v115_v44 }
 0x1b4   :  { %v205_v49 = vpop.f32.mrb[0].mxu1 }
 0x1b5   :  { %v206_v50 = vadd.f32 %v308_v48, %v205_v49  ;;  %v384_v51 = vpop.f32.mrb[1].mxu1 }
 0x1b7   :  { %v209_v52 = vmax.f32 %v206_v50, 0.0 }
 0x1b9   :  { %402 = vmatmul.mubr.msk.f32.vlgmr.msra.gmra.mrb[2].mxu0 %vm225_vm3, %v209_v52 }
 0x28c   :  { %v295_v54 = vpop.f32.mrb[2].mxu0 }
 0x28d   :  { %v296_v55 = vadd.f32 %v309_v53, %v295_v54  ;;  %v403_v56 = vpop.f32.mrb[3].mxu0 }
 0x28f   :  { %300 = vst.msk [vmem:[%s608_s7] sm:$0xff] %vm299_vm4, %v296_v55 }

</bundles_post_ra>
